<compile_context>
chip_gen: v7x
topology: tpu7x:2x2x1
jax: 0.10.0
libtpu: 0.0.40
codegen_flags: <defaults>
</compile_context>

<pallas_src>
import functools

import jax
import jax.numpy as jnp
from jax.experimental import pallas as pl
from jax.experimental.pallas import tpu as pltpu


_LANE = 128
_TARGET_BLOCK_BYTES = 8 * 1024 * 1024        # single-pass per-block target (~roofline)
_TWO_PASS_BLOCK_BYTES = 4 * 1024 * 1024      # HW-tile target for the two-pass path
_VMEM_RESERVE_BYTES = 8 * 1024 * 1024        # weights + (Bt,C)/(Bt,Cr) temporaries


# ---------------------------------------------------------------------------
# Kernels
# ---------------------------------------------------------------------------
def _se_kernel(x_ref, w1t_ref, b1_ref, w2t_ref, b2_ref, o_ref, *,
               inv_hw, channels_last):
    """Single-pass SE: squeeze + excitation + scale on one batch tile."""
    x = x_ref[...]                                   # native dtype block
    red_axis = 1 if channels_last else 2

    # Squeeze: fused f32 accumulation (no full-slab f32 temporary).
    s = jnp.sum(x, axis=red_axis, dtype=jnp.float32) * inv_hw          # (Bt, C)

    # Excitation: fc1 + ReLU, fc2 + sigmoid (row-batched, tiny).
    h = jnp.dot(s, w1t_ref[...].astype(jnp.float32),
                preferred_element_type=jnp.float32) + b1_ref[...].astype(jnp.float32)
    h = jnp.maximum(h, 0.0)
    e = jnp.dot(h, w2t_ref[...].astype(jnp.float32),
                preferred_element_type=jnp.float32) + b2_ref[...].astype(jnp.float32)
    e = jax.nn.sigmoid(e)

    # Scale in native dtype (no f32 copy of the big slab).
    g = e.astype(x.dtype)
    if channels_last:
        o_ref[...] = x * g[:, None, :]               # gate stays lane-resident
    else:
        o_ref[...] = x * g[:, :, None]               # tiny relayout, hidden by HBM stream


def _se_reduce_kernel(x_ref, sum_ref, *, hw_true):
    """Two-pass, pass 1: accumulate per-(b, c) sums over HW tiles."""
    x = x_ref[...]                                   # (1, C, HWt)
    hwt = x.shape[2]
    start = pl.program_id(1) * hwt
    col = start + jax.lax.broadcasted_iota(jnp.int32, x.shape, 2)
    xm = jnp.where(col < hw_true, x, jnp.zeros_like(x))   # mask ragged HW tail
    part = jnp.sum(xm, axis=2, dtype=jnp.float32, keepdims=True)        # (1, C, 1)

    @pl.when(pl.program_id(1) == 0)
    def _():
        sum_ref[...] = jnp.zeros_like(sum_ref)
    sum_ref[...] += part


def _se_scale_kernel(x_ref, g_ref, o_ref):
    """Two-pass, pass 2: fully parallel scale by the precomputed gate."""
    o_ref[...] = x_ref[...] * g_ref[...]             # (1, C, HWt) * (1, C, 1)


# ---------------------------------------------------------------------------
# Trace-time hardware / tiling heuristics
# ---------------------------------------------------------------------------
def _vmem_budget_bytes():
    cap = None
    try:
        cap = getattr(pltpu.get_tpu_info(), "vmem_capacity_bytes", None)
    except Exception:
        cap = None
    if not cap:
        cap = 64 * 1024 * 1024                       # conservative (v7x physical)
    return int(cap * 3 // 4)                         # single headroom factor


def _num_tensorcores():
    """Best-effort TC-per-device count (2 on v7x, 1 on v5e/v6e)."""
    try:
        info = pltpu.get_tpu_info()
        for name in ("num_cores", "core_count", "num_tensorcores"):
            v = getattr(info, name, None)
            if v:
                return max(1, min(int(v), 2))
    except Exception:
        pass
    try:
        v = getattr(jax.devices()[0], "num_cores", None)
        if v:
            return max(1, min(int(v), 2))
    except Exception:
        pass
    return 1


def _pick_batch_tile(B, slab_bytes, budget, num_cores):
    """Batch tile for the single pass; None if a single slab does not fit."""
    usable = budget - _VMEM_RESERVE_BYTES
    bt_max = usable // (4 * slab_bytes)              # 2 buffers x (in + out)
    if bt_max < 1:
        return None                                  # -> two-pass path
    bt = max(1, min(B, bt_max, max(1, _TARGET_BLOCK_BYTES // slab_bytes)))
    if num_cores > 1:
        # v7x: keep the step count a multiple of the TC count when possible.
        for cand in range(bt, 0, -1):
            if pl.cdiv(B, cand) % num_cores == 0:
                bt = cand
                break
    return bt


def _pick_hw_tile(C, HW, itemsize, override=None):
    if override is not None:
        hwt = int(override)
    else:
        hwt = max(_LANE, (_TWO_PASS_BLOCK_BYTES // max(1, C * itemsize)) // _LANE * _LANE)
    if hwt >= HW:
        return HW                                    # full dim (always legal)
    return max(_LANE, hwt // _LANE * _LANE)          # lane-dense tile


# ---------------------------------------------------------------------------
# pallas_call wrappers
# ---------------------------------------------------------------------------
def _single_pass(x, w1t, b1r, w2t, b2r, bt, channels_last, hw_true,
                 vmem_limit, donate_x):
    B = x.shape[0]
    C, Cr = w1t.shape
    steps = pl.cdiv(B, bt)
    blk = (bt,) + x.shape[1:]
    kernel = functools.partial(_se_kernel, inv_hw=1.0 / hw_true,
                               channels_last=channels_last)
    # TODO(synk): on v7x, if xprof shows gaps between block DMAs, set
    # pipeline_mode=pl.Buffered(3) on the x BlockSpec and shrink bt to match.
    return pl.pallas_call(
        kernel,
        out_shape=jax.ShapeDtypeStruct(x.shape, x.dtype),
        grid_spec=pltpu.PrefetchScalarGridSpec(
            num_scalar_prefetch=0,
            grid=(steps,),
            in_specs=[
                pl.BlockSpec(blk, lambda b: (b, 0, 0)),
                pl.BlockSpec((C, Cr), lambda b: (0, 0)),
                pl.BlockSpec((1, Cr), lambda b: (0, 0)),
                pl.BlockSpec((Cr, C), lambda b: (0, 0)),
                pl.BlockSpec((1, C), lambda b: (0, 0)),
            ],
            out_specs=pl.BlockSpec(blk, lambda b: (b, 0, 0)),
        ),
        compiler_params=pltpu.CompilerParams(
            dimension_semantics=("parallel",),
            vmem_limit_bytes=vmem_limit,
        ),
        input_output_aliases={0: 0} if donate_x else {},
    )(x, w1t, b1r, w2t, b2r)


def _two_pass(x3, w1t, b1r, w2t, b2r, hw_tile, hw_true, vmem_limit):
    B, C, HW = x3.shape
    n_hw = pl.cdiv(HW, hw_tile)

    # Pass 1: per-(b, c) sums, accumulated over lane-dense HW tiles.
    sums = pl.pallas_call(
        functools.partial(_se_reduce_kernel, hw_true=hw_true),
        out_shape=jax.ShapeDtypeStruct((B, C, 1), jnp.float32),
        grid_spec=pltpu.PrefetchScalarGridSpec(
            num_scalar_prefetch=0,
            grid=(B, n_hw),
            in_specs=[pl.BlockSpec((1, C, hw_tile), lambda b, k: (b, 0, k))],
            out_specs=pl.BlockSpec((1, C, 1), lambda b, k: (b, 0, 0)),
        ),
        compiler_params=pltpu.CompilerParams(
            dimension_semantics=("parallel", "arbitrary"),
            vmem_limit_bytes=vmem_limit,
        ),
    )(x3)

    # Tiny excitation MLP in plain JAX (B x C values; not worth a kernel).
    s = sums[:, :, 0] * (1.0 / hw_true)
    h = jnp.maximum(jnp.dot(s, w1t.astype(jnp.float32)) + b1r.astype(jnp.float32), 0.0)
    e = jax.nn.sigmoid(jnp.dot(h, w2t.astype(jnp.float32)) + b2r.astype(jnp.float32))
    gate = e.astype(x3.dtype)[:, :, None]            # (B, C, 1)

    # Pass 2: fully parallel re-stream + scale.
    out = pl.pallas_call(
        _se_scale_kernel,
        out_shape=jax.ShapeDtypeStruct(x3.shape, x3.dtype),
        grid_spec=pltpu.PrefetchScalarGridSpec(
            num_scalar_prefetch=0,
            grid=(B, n_hw),
            in_specs=[
                pl.BlockSpec((1, C, hw_tile), lambda b, k: (b, 0, k)),
                pl.BlockSpec((1, C, 1), lambda b, k: (b, 0, 0)),
            ],
            out_specs=pl.BlockSpec((1, C, hw_tile), lambda b, k: (b, 0, k)),
        ),
        compiler_params=pltpu.CompilerParams(
            dimension_semantics=("parallel", "parallel"),
            vmem_limit_bytes=vmem_limit,
        ),
    )(x3, gate)
    return out


def se_block(x_nchw, w1, b1, w2, b2, *, donate_x=False, force_two_pass=False,
             batch_tile=None, hw_tile=None):
    """SEBlock forward.

    x_nchw: (B, C, H, W).  w1: (Cr, C) or (Cr, C, 1, 1), b1: (Cr,)-like,
    w2: (C, Cr) or (C, Cr, 1, 1), b2: (C,)-like (the 1x1-conv parameters).
    Works for f32 or bf16 x (squeeze always accumulates in f32).
    """
    B, C, H, W = x_nchw.shape
    HW = H * W
    Cr = w1.shape[0]
    itemsize = jnp.dtype(x_nchw.dtype).itemsize

    w1t = jnp.transpose(jnp.reshape(w1, (Cr, C)))    # (C, Cr)
    w2t = jnp.transpose(jnp.reshape(w2, (C, Cr)))    # (Cr, C)
    b1r = jnp.reshape(b1, (1, Cr))
    b2r = jnp.reshape(b2, (1, C))

    budget = _vmem_budget_bytes()
    cores = _num_tensorcores()
    slab = C * HW * itemsize

    x3 = jnp.reshape(x_nchw, (B, C, HW))             # free (contiguous) reshape

    bt = batch_tile if batch_tile is not None else _pick_batch_tile(B, slab, budget, cores)
    if force_two_pass or bt is None:
        hwt = _pick_hw_tile(C, HW, itemsize, hw_tile)
        out3 = _two_pass(x3, w1t, b1r, w2t, b2r, hwt, HW, budget)
        return jnp.reshape(out3, (B, C, H, W))

    # Lane-dense layout choice for the streaming slab.
    channels_last = (HW % _LANE != 0) and (C % _LANE == 0)
    if channels_last:
        xk = jnp.transpose(x3, (0, 2, 1))            # (B, HW, C): C on lanes
    else:
        # TODO(synk): when neither HW nor C is a 128-multiple, optionally
        # zero-pad HW to the next 128 multiple (only when padding < ~5%).
        xk = x3
    outk = _single_pass(xk, w1t, b1r, w2t, b2r, bt, channels_last, HW, budget, donate_x)
    out3 = jnp.transpose(outk, (0, 2, 1)) if channels_last else outk
    return jnp.reshape(out3, (B, C, H, W))


def se_block_ref(x, w1, b1, w2, b2):
    """Plain-JAX reference mirroring the PyTorch forward (f32 math)."""
    w1 = jnp.reshape(w1, (w1.shape[0], -1))
    w2 = jnp.reshape(w2, (w2.shape[0], -1))
    s = jnp.mean(x.astype(jnp.float32), axis=(2, 3), keepdims=True)      # (B,C,1,1)
    h = jnp.einsum('rc,bcij->brij', w1, s) + jnp.reshape(b1, (1, -1, 1, 1))
    h = jnp.maximum(h, 0.0)
    e = jnp.einsum('cr,brij->bcij', w2, h) + jnp.reshape(b2, (1, -1, 1, 1))
    e = jax.nn.sigmoid(e)
    # Note: the kernel multiplies in x's native dtype; for bf16 inputs loosen
    # the tolerance accordingly (exact match for f32).
    return (e * x.astype(jnp.float32)).astype(x.dtype)


if __name__ == "__main__":
    key = jax.random.PRNGKey(0)

    def make(shape_bchw, reduction_ratio, k):
        b, c, h, w = shape_bchw
        cr = max(1, c // reduction_ratio)
        kx, k1, k2, k3, k4 = jax.random.split(k, 5)
        x = jax.random.normal(kx, (b, c, h, w), dtype=jnp.float32)
        w1 = jax.random.normal(k1, (cr, c), dtype=jnp.float32) * 0.1
        b1 = jax.random.normal(k2, (cr,), dtype=jnp.float32) * 0.1
        w2 = jax.random.normal(k3, (c, cr), dtype=jnp.float32) * 0.1
        b2 = jax.random.normal(k4, (c,), dtype=jnp.float32) * 0.1
        return x, w1, b1, w2, b2

    def check(out, ref, tag):
        assert out.shape == ref.shape, (tag, out.shape, ref.shape)
        err = float(jnp.max(jnp.abs(out - ref)))
        assert jnp.allclose(out, ref, atol=1e-5, rtol=1e-5), (tag, err)

    ka, kb, kc, kd = jax.random.split(key, 4)

    # 1) lane-dense HW (HW = 256), single-pass (B, C, HW) layout.
    x, w1, b1, w2, b2 = make((2, 64, 16, 16), 16, ka)
    out = jax.block_until_ready(se_block(x, w1, b1, w2, b2))
    check(out, se_block_ref(x, w1, b1, w2, b2), "single_pass_c_hw")

    # 2) channels-last path (HW = 25 not lane-aligned, C = 128 is).
    x, w1, b1, w2, b2 = make((2, 128, 5, 5), 16, kb)
    out = jax.block_until_ready(se_block(x, w1, b1, w2, b2))
    check(out, se_block_ref(x, w1, b1, w2, b2), "single_pass_hw_c")

    # 3) ragged batch tiling (B = 3, Bt = 2 -> cdiv grid, dropped tail row).
    x, w1, b1, w2, b2 = make((3, 64, 16, 16), 16, kc)
    out = jax.block_until_ready(se_block(x, w1, b1, w2, b2, batch_tile=2))
    check(out, se_block_ref(x, w1, b1, w2, b2), "single_pass_ragged_batch")

    # 4) two-pass reduce+scale path with a ragged HW tail (324 = 2*128 + 68).
    x, w1, b1, w2, b2 = make((2, 64, 18, 18), 16, kd)
    out = jax.block_until_ready(
        se_block(x, w1, b1, w2, b2, force_two_pass=True, hw_tile=128))
    check(out, se_block_ref(x, w1, b1, w2, b2), "two_pass")

    print("KERNEL_OK")
</pallas_src>

<mosaic_0001>
module attributes {stable_mosaic.version = 11 : i64} {
  func.func @_se_kernel(%arg0: i32, %arg1: memref<2x64x256xf32, #tpu.memory_space<vmem>>, %arg2: memref<64x4xf32, #tpu.memory_space<vmem>>, %arg3: memref<1x4xf32, #tpu.memory_space<vmem>>, %arg4: memref<4x64xf32, #tpu.memory_space<vmem>>, %arg5: memref<1x64xf32, #tpu.memory_space<vmem>>, %arg6: memref<2x64x256xf32, #tpu.memory_space<vmem>>) attributes {dimension_semantics = [#tpu.dimension_semantics<parallel>], iteration_bounds = array<i64: 1>, scalar_prefetch = 0 : i64, scratch_operands = 0 : i64, tpu.core_type = #tpu.core_type<tc>, window_params = [{transform_indices = @transform_0, window_bounds = array<i64: 2, 64, 256>}, {pipeline_mode = #tpu.pipeline_mode<synchronous>, transform_indices = @transform_1, window_bounds = array<i64: 64, 4>}, {pipeline_mode = #tpu.pipeline_mode<synchronous>, transform_indices = @transform_2, window_bounds = array<i64: 1, 4>}, {pipeline_mode = #tpu.pipeline_mode<synchronous>, transform_indices = @transform_3, window_bounds = array<i64: 4, 64>}, {pipeline_mode = #tpu.pipeline_mode<synchronous>, transform_indices = @transform_4, window_bounds = array<i64: 1, 64>}, {transform_indices = @transform_5, window_bounds = array<i64: 2, 64, 256>}]} {
    %c0 = arith.constant 0 : index
    %c0_0 = arith.constant 0 : index
    %c0_1 = arith.constant 0 : index
    %0 = vector.load %arg1[%c0, %c0_0, %c0_1] : memref<2x64x256xf32, #tpu.memory_space<vmem>>, vector<2x64x256xf32>
    %cst = arith.constant dense<0.000000e+00> : vector<2x64xf32>
    %1 = vector.multi_reduction <add>, %0, %cst [2] : vector<2x64x256xf32> to vector<2x64xf32>
    %cst_2 = arith.constant 3.906250e-03 : f32
    %2 = vector.broadcast %cst_2 : f32 to vector<2x64xf32>
    %3 = arith.mulf %1, %2 : vector<2x64xf32>
    %c0_3 = arith.constant 0 : index
    %c0_4 = arith.constant 0 : index
    %4 = vector.load %arg2[%c0_3, %c0_4] : memref<64x4xf32, #tpu.memory_space<vmem>>, vector<64x4xf32>
    %cst_5 = arith.constant dense<0.000000e+00> : vector<2x4xf32>
    %5 = tpu.matmul %3, %4, %cst_5 {dimension_numbers = #tpu.dot_dimension_numbers<[1], [0], [0], [1], [0, 0, 1, 1], [], []>} : vector<2x64xf32>, vector<64x4xf32>, vector<2x4xf32> -> vector<2x4xf32>
    %c0_6 = arith.constant 0 : index
    %c0_7 = arith.constant 0 : index
    %6 = vector.load %arg3[%c0_6, %c0_7] : memref<1x4xf32, #tpu.memory_space<vmem>>, vector<1x4xf32>
    %7 = vector.broadcast %6 : vector<1x4xf32> to vector<2x4xf32>
    %8 = arith.addf %5, %7 : vector<2x4xf32>
    %cst_8 = arith.constant 0.000000e+00 : f32
    %9 = vector.broadcast %cst_8 : f32 to vector<2x4xf32>
    %10 = arith.maximumf %8, %9 : vector<2x4xf32>
    %c0_9 = arith.constant 0 : index
    %c0_10 = arith.constant 0 : index
    %11 = vector.load %arg4[%c0_9, %c0_10] : memref<4x64xf32, #tpu.memory_space<vmem>>, vector<4x64xf32>
    %cst_11 = arith.constant dense<0.000000e+00> : vector<2x64xf32>
    %12 = tpu.matmul %10, %11, %cst_11 {dimension_numbers = #tpu.dot_dimension_numbers<[1], [0], [0], [1], [0, 0, 1, 1], [], []>} : vector<2x4xf32>, vector<4x64xf32>, vector<2x64xf32> -> vector<2x64xf32>
    %c0_12 = arith.constant 0 : index
    %c0_13 = arith.constant 0 : index
    %13 = vector.load %arg5[%c0_12, %c0_13] : memref<1x64xf32, #tpu.memory_space<vmem>>, vector<1x64xf32>
    %14 = vector.broadcast %13 : vector<1x64xf32> to vector<2x64xf32>
    %15 = arith.addf %12, %14 : vector<2x64xf32>
    %16 = arith.negf %15 : vector<2x64xf32>
    %17 = math.exp %16 : vector<2x64xf32>
    %cst_14 = arith.constant 1.000000e+00 : f32
    %18 = vector.broadcast %cst_14 : f32 to vector<2x64xf32>
    %19 = arith.addf %18, %17 : vector<2x64xf32>
    %20 = arith.divf %18, %19 : vector<2x64xf32>
    %21 = vector.shape_cast %20 : vector<2x64xf32> to vector<2x64x1xf32>
    %22 = vector.broadcast %21 : vector<2x64x1xf32> to vector<2x64x256xf32>
    %23 = arith.mulf %0, %22 : vector<2x64x256xf32>
    %c0_15 = arith.constant 0 : index
    %c0_16 = arith.constant 0 : index
    %c0_17 = arith.constant 0 : index
    %24 = vector.load %arg6[%c0_15, %c0_16, %c0_17] : memref<2x64x256xf32, #tpu.memory_space<vmem>>, vector<2x64x256xf32>
    tpu.vector_store %arg6[%c0_15, %c0_16, %c0_17], %23 {strides = array<i32>} : memref<2x64x256xf32, #tpu.memory_space<vmem>>, vector<2x64x256xf32>,
    return
  }
  func.func @transform_0(%arg0: i32) -> (i32, i32, i32) {
    %c0_i32 = arith.constant 0 : i32
    %c0_i32_0 = arith.constant 0 : i32
    %c0_i32_1 = arith.constant 0 : i32
    return %arg0, %c0_i32, %c0_i32_0 : i32, i32, i32
  }
  func.func @transform_1(%arg0: i32) -> (i32, i32) {
    %c0_i32 = arith.constant 0 : i32
    %c0_i32_0 = arith.constant 0 : i32
    %c0_i32_1 = arith.constant 0 : i32
    return %c0_i32, %c0_i32_0 : i32, i32
  }
  func.func @transform_2(%arg0: i32) -> (i32, i32) {
    %c0_i32 = arith.constant 0 : i32
    %c0_i32_0 = arith.constant 0 : i32
    %c0_i32_1 = arith.constant 0 : i32
    return %c0_i32, %c0_i32_0 : i32, i32
  }
  func.func @transform_3(%arg0: i32) -> (i32, i32) {
    %c0_i32 = arith.constant 0 : i32
    %c0_i32_0 = arith.constant 0 : i32
    %c0_i32_1 = arith.constant 0 : i32
    return %c0_i32, %c0_i32_0 : i32, i32
  }
  func.func @transform_4(%arg0: i32) -> (i32, i32) {
    %c0_i32 = arith.constant 0 : i32
    %c0_i32_0 = arith.constant 0 : i32
    %c0_i32_1 = arith.constant 0 : i32
    return %c0_i32, %c0_i32_0 : i32, i32
  }
  func.func @transform_5(%arg0: i32) -> (i32, i32, i32) {
    %c0_i32 = arith.constant 0 : i32
    %c0_i32_0 = arith.constant 0 : i32
    %c0_i32_1 = arith.constant 0 : i32
    return %arg0, %c0_i32, %c0_i32_0 : i32, i32, i32
  }
}

</mosaic_0001>

<bundles_post_ra>
// kernel: tpu_custom_call.1
= control target key start
LH: loop header
LB: loop body
LE: loop exit
PB: predicated region body
PF: predicated region fallthrough
CT: control target
= control target key end

     0   :  { %10 = vsyncpa [#allocation3], 0  ;;  %s939_s0 = inlined_call_operand.hbm [shape: f32[2,64,256], index: 0, kind: input, shape index: {}]   ;;  %s940_s1 = inlined_call_operand.vmem [shape: f32[64,4], index: 1, kind: input, shape index: {}]   ;;  %s941_s2 = inlined_call_operand.vmem [shape: f32[1,4], index: 2, kind: input, shape index: {}]   ;;  %s942_s3 = inlined_call_operand.vmem [shape: f32[4,64], index: 3, kind: input, shape index: {}]   ;;  %s943_s4 = inlined_call_operand.vmem [shape: f32[1,64], index: 4, kind: input, shape index: {}]   ;;  %s944_s5 = inlined_call_operand.hbm [shape: f32[2,64,256], index: 5, kind: output, shape index: {}]  }
   0x1   :  { %11 = vsyncpa [#allocation4], 0  ;;  %s687_s18 = smov [#allocation2]   ;;  %s639_s22 = scalar_lea.hbm %s939_s0, 4096 }
   0x2   :  { %s17_s19 = sshll.u32 %s687_s18, 4  ;;  %p640_p0 = scmp.ne.s32.totalorder %s939_s0, %s639_s22  ;;  %s18_s19 = int_to_ptr.vmem [resolvable:$true] %s17_s19 }
   0x3   :  { %p643_p1 = scmp.lt.u32.totalorder %s639_s22, %s939_s0 }
   0x5   :  { %p645_p2 = pnand %p643_p1, %p640_p0 }
   0x7   :  { %648 = shalt.err (!%p645_p2)
}
   0x8   :  { %s649_s27 = scalar_lea.vmem %s18_s19, 4096  ;;  %p654_p4 = scmp.lt.s32.totalorder %s18_s19, %s18_s19 }
   0x9   :  { %p650_p3 = scmp.ne.s32.totalorder %s18_s19, %s649_s27  ;;  %p655_p5 = scmp.lt.s32.totalorder %s649_s27, %s649_s27 }
   0xb   :  { %p656_p6 = por %p655_p5, %p654_p4 }
   0xd   :  { %p657_p7 = pnand %p656_p6, %p650_p3 }
   0xf   :  { %660 = shalt.err (!%p657_p7)
}
  0x10   :  { %s688_s28 = smov 256   ;;  %s689_s29 = smov 16  }
  0x11   :  { %23 = dma.hbm_to_vmem [thread:$0]  %s939_s0, 4096, %s18_s19, [#allocation3], %s688_s28, %s688_s28, %s689_s29  }
  0x12   :  { %683 = dma.done.wait [#allocation3], 4096  }
  0x13   :  { %684 = vsyncadd [#allocation3], 4294963200  ;;  %v739_v0 = vld [vmem:[#allocation2 + $0x80] sm:$0xff]  ;;  %v741_v1 = vld [vmem:[#allocation2 + $0x88] sm:$0xff]  ;;  %v690_v51 = vmov 0.0|0.0   ;;  %vm691_vm0 = vmmov 0  }
  0x14   :  { %v743_v2 = vld [vmem:[#allocation2] sm:$0xff]  ;;  %v91_v3 = vadd.f32 %v741_v1, %v739_v0  ;;  %v747_v4 = vld [vmem:[#allocation2 + $0x8] sm:$0xff]  ;;  %v749_v5 = vld [vmem:[#allocation2 + $0x90] sm:$0xff]  ;;  %616 = vmatprep.subr.bf16.mxu0 %v690_v51  ;;  %v692_v61 = vmov 0.0   ;;  %vm173_vm1 = vcmask 130112   ;;  %vm180_vm2 = vcmask 195712  }
  0x15   :  { %v751_v6 = vld [vmem:[#allocation2 + $0x98] sm:$0xff]  ;;  %v67_v7 = vadd.f32 %v747_v4, %v743_v2  ;;  %v755_v8 = vld [vmem:[#allocation2 + $0x10] sm:$0xff]  ;;  %v763_v12 = vld [vmem:[#allocation2 + $0xa0] sm:$0xff]  ;;  %608 = vmatprep.mubr.msk.f32.mxu0 %vm691_vm0, %v692_v61  ;;  %611 = vmatprep.subr.mxu1 %v692_v61  ;;  %vm187_vm3 = vcmask 261312   ;;  %vm194_vm4 = vcmask 326912   ;;  %vm201_vm5 = vcmask 392512  }
  0x16   :  { %v757_v9 = vld [vmem:[#allocation2 + $0x18] sm:$0xff]  ;;  %92 = vadd.xlane.f32.xlu1 %v91_v3  ;;  %v94_v10 = vadd.f32 %v751_v6, %v749_v5  ;;  %v765_v13 = vld [vmem:[#allocation2 + $0xa8] sm:$0xff]  ;;  %v767_v14 = vld [vmem:[#allocation2 + $0x20] sm:$0xff]  ;;  %613 = vmatprep.mubr.msk.f32.mxu1 %vm691_vm0, %v692_v61  ;;  %vm208_vm6 = vcmask 458112   ;;  %vm215_vm7 = vcmask 523712   ;;  %vm256_vm8 = vcmask 1041409  }
  0x17   :  { %68 = vadd.xlane.f32.xlu0 %v67_v7  ;;  %v70_v11 = vadd.f32 %v757_v9, %v755_v8  ;;  %v769_v15 = vld [vmem:[#allocation2 + $0x28] sm:$0xff]  ;;  %v97_v16 = vadd.f32 %v765_v13, %v763_v12  ;;  %v775_v18 = vld [vmem:[#allocation2 + $0xb0] sm:$0xff]  ;;  %v777_v19 = vld [vmem:[#allocation2 + $0xb8] sm:$0xff]  ;;  %vm258_vm9 = vcmask 523264   ;;  %vm344_vm10 = vcmask 1043456  }
  0x18   :  { %v73_v17 = vadd.f32 %v769_v15, %v767_v14  ;;  %952 = vst [vmem:[#allocation8_spill] sm:$0xff] %v777_v19  ;;  %v779_v20 = vld [vmem:[#allocation2 + $0x30] sm:$0xff]  ;;  %v781_v21 = vld [vmem:[#allocation2 + $0x38] sm:$0xff]  ;;  %v100_v22 = vadd.f32 %v777_v19, %v775_v18  ;;  %v787_v24 = vld [vmem:[#allocation2 + $0xc0] sm:$0xff]  ;;  %vm340_vm11 = vcmask 31744  }
  0x19   :  { %v76_v23 = vadd.f32 %v781_v21, %v779_v20  ;;  %v789_v25 = vld [vmem:[#allocation2 + $0xc8] sm:$0xff]  ;;  %v791_v26 = vld [vmem:[#allocation2 + $0x40] sm:$0xff]  ;;  %v799_v30 = vld [vmem:[#allocation2 + $0xd0] sm:$0xff] }
  0x1a   :  { %95 = vadd.xlane.f32.xlu1 %v94_v10  ;;  %v793_v27 = vld [vmem:[#allocation2 + $0x48] sm:$0xff]  ;;  %v103_v28 = vadd.f32 %v789_v25, %v787_v24  ;;  %953 = vst [vmem:[#allocation9_spill] sm:$0xff] %v799_v30  ;;  %v801_v31 = vld [vmem:[#allocation2 + $0xd8] sm:$0xff]  ;;  %v803_v32 = vld [vmem:[#allocation2 + $0x50] sm:$0xff]  ;;  %v162_v10 = vlaneseq }
  0x1b   :  { %71 = vadd.xlane.f32.xlu0 %v70_v11  ;;  %v79_v29 = vadd.f32 %v793_v27, %v791_v26  ;;  %954 = vst [vmem:[#allocation10_spill] sm:$0xff] %v801_v31  ;;  %v805_v33 = vld [vmem:[#allocation2 + $0x58] sm:$0xff]  ;;  %v106_v34 = vadd.f32 %v801_v31, %v799_v30  ;;  %v811_v36 = vld [vmem:[#allocation2 + $0xe0] sm:$0xff]  ;;  %v813_v37 = vld [vmem:[#allocation2 + $0xe8] sm:$0xff] }
  0x1c   :  { %v82_v35 = vadd.f32 %v805_v33, %v803_v32  ;;  %955 = vst [vmem:[#allocation11_spill] sm:$0xff] %v811_v36  ;;  %956 = vst [vmem:[#allocation12_spill] sm:$0xff] %v813_v37  ;;  %v815_v38 = vld [vmem:[#allocation2 + $0x60] sm:$0xff]  ;;  %v817_v39 = vld [vmem:[#allocation2 + $0x68] sm:$0xff]  ;;  %v109_v40 = vadd.f32 %v813_v37, %v811_v36 }
  0x1d   :  { %v85_v41 = vadd.f32 %v817_v39, %v815_v38  ;;  %v823_v42 = vld [vmem:[#allocation2 + $0xf0] sm:$0xff]  ;;  %v825_v43 = vld [vmem:[#allocation2 + $0xf8] sm:$0xff]  ;;  %v131_v48 = vld [vmem:[%s940_s1] sm:$0xff] }
  0x1e   :  { %98 = vadd.xlane.f32.xlu1 %v97_v16  ;;  %957 = vst [vmem:[#allocation13_spill] sm:$0xff] %v823_v42  ;;  %958 = vst [vmem:[#allocation14_spill] sm:$0xff] %v825_v43  ;;  %v827_v44 = vld [vmem:[#allocation2 + $0x70] sm:$0xff]  ;;  %v829_v45 = vld [vmem:[#allocation2 + $0x78] sm:$0xff]  ;;  %v112_v46 = vadd.f32 %v825_v43, %v823_v42 }
  0x1f   :  { %74 = vadd.xlane.f32.xlu0 %v73_v17  ;;  %v88_v47 = vadd.f32 %v829_v45, %v827_v44  ;;  %v132_v49 = vld [vmem:[%s940_s1 + $0x8] sm:$0xff]  ;;  %v133_v52 = vld [vmem:[%s940_s1 + $0x10] sm:$0xff]  ;;  %v134_v53 = vld [vmem:[%s940_s1 + $0x18] sm:$0xff]  ;;  %v163_v17 = vand.u32 127, %v162_v10 }
  0x20   :  { %v617_v50 = vpack.c.bf16 %v132_v49, %v131_v48  ;;  %v620_v54 = vpack.c.bf16 %v134_v53, %v133_v52  ;;  %v135_v55 = vld [vmem:[%s940_s1 + $0x20] sm:$0xff]  ;;  %v136_v56 = vld [vmem:[%s940_s1 + $0x28] sm:$0xff]  ;;  %v137_v58 = vld [vmem:[%s940_s1 + $0x30] sm:$0xff] }
  0x21   :  { %v623_v57 = vpack.c.bf16 %v136_v56, %v135_v55  ;;  %v138_v59 = vld [vmem:[%s940_s1 + $0x38] sm:$0xff] }
  0x22   :  { %101 = vadd.xlane.f32.xlu1 %v100_v22  ;;  %618 = vmatpush3.bf16.msra.mxu0 %v617_v50  ;;  %v626_v60 = vpack.c.bf16 %v138_v59, %v137_v58 }
  0x23   :  { %77 = vadd.xlane.f32.xlu0 %v76_v23  ;;  %619 = vmatprep.subr.bf16.mxu0 %v690_v51  ;;  %v859_v23 = vshrl.u32 %v162_v10, 7 }
  0x26   :  { %104 = vadd.xlane.f32.xlu1 %v103_v28  ;;  %621 = vmatpush3.bf16.msra.mxu0 %v620_v54 }
  0x27   :  { %80 = vadd.xlane.f32.xlu0 %v79_v29  ;;  %622 = vmatprep.subr.bf16.mxu0 %v690_v51  ;;  %v168_v29 = vadd.s32 4294967288, %v163_v17 }
  0x29   :  { %v171_v49 = vsub.s32 %v168_v29, %v859_v23 }
  0x2a   :  { %107 = vadd.xlane.f32.xlu1 %v106_v34  ;;  %624 = vmatpush3.bf16.msra.mxu0 %v623_v57  ;;  %v175_v34 = vadd.s32 4294967280, %v163_v17 }
  0x2b   :  { %83 = vadd.xlane.f32.xlu0 %v82_v35  ;;  %625 = vmatprep.subr.bf16.mxu0 %v690_v51  ;;  %v182_v35 = vadd.s32 4294967272, %v163_v17  ;;  %v203_v51 = vadd.s32 4294967248, %v163_v17 }
  0x2c   :  { %v178_v50 = vsub.s32 %v175_v34, %v859_v23 }
  0x2d   :  { %v185_v53 = vsub.s32 %v182_v35, %v859_v23 }
  0x2e   :  { %110 = vadd.xlane.f32.xlu1 %v109_v40  ;;  %627 = vmatpush3.bf16.msra.mxu0 %v626_v60  ;;  %v189_v40 = vadd.s32 4294967264, %v163_v17 }
  0x2f   :  { %86 = vadd.xlane.f32.xlu0 %v85_v41 }
  0x30   :  { %v192_v54 = vsub.s32 %v189_v40, %v859_v23  ;;  %v210_v40 = vadd.s32 4294967240, %v163_v17 }
  0x32   :  { %113 = vadd.xlane.f32.xlu1 %v112_v46  ;;  %v196_v46 = vadd.s32 4294967256, %v163_v17 }
  0x33   :  { %89 = vadd.xlane.f32.xlu0 %v88_v47  ;;  %v166_v47 = vsub.s32 %v163_v17, %v859_v23  ;;  %v213_v17 = vsub.s32 %v210_v40, %v859_v23  ;;  %v575_v40 = vld [vmem:[%s941_s2] ss:$0 sm:$0xff]  ;;  %s693_s2 = smov [#allocation5]  }
  0x34   :  { %v199_v57 = vsub.s32 %v196_v46, %v859_v23 }
  0xa3   :  { %v93_v62 = vpop.xlane.xlu1 %92 }
  0xa4   :  { %v69_v63 = vpop.xlane.xlu0 %68  ;;  %v123_v59 = vmul.f32 0.00390625, %v93_v62 }
  0xa5   :  { %v115_v29 = vmul.f32 0.00390625, %v69_v63 }
  0xa6   :  { %v220_v37 = vrot.slane %v123_v59, %v166_v47 }
  0xa7   :  { %v96_v3 = vpop.xlane.xlu1 %95  ;;  %v167_v19 = vrot.slane %v115_v29, %v166_v47 }
  0xa8   :  { %v72_v7 = vpop.xlane.xlu0 %71  ;;  %v124_v52 = vmul.f32 0.00390625, %v96_v3  ;;  %v206_v3 = vsub.s32 %v203_v51, %v859_v23 }
  0xa9   :  { %v116_v55 = vmul.f32 0.00390625, %v72_v7 }
  0xaa   :  { %v224_v35 = vrot.slane %v124_v52, %v171_v49 }
  0xab   :  { %v99_v11 = vpop.xlane.xlu1 %98  ;;  %v172_v7 = vrot.slane %v116_v55, %v171_v49 }
  0xac   :  { %v75_v16 = vpop.xlane.xlu0 %74  ;;  %v125_v56 = vmul.f32 0.00390625, %v99_v11  ;;  %v225_v51 = vsel %vm173_vm1, %v224_v35, %v220_v37  ;;  %v332_v35 = vld [vmem:[%s942_s3] sm:$0xf]  ;;  %s563_s3 = sshll.u32 %s693_s2, 4  ;;  %s564_s3 = int_to_ptr.vmem [resolvable:$true] %s563_s3 }
  0xad   :  { %v117_v60 = vmul.f32 0.00390625, %v75_v16  ;;  %v174_v49 = vsel %vm173_vm1, %v172_v7, %v167_v19  ;;  %612 = vmatpush3.msk.msra.mxu1 %vm344_vm10, %v332_v35  ;;  %v960_v35 = vld [vmem:[#allocation11_spill] sm:$0xff]  ;;  %p666_p9 = scmp.lt.s32.totalorder %s564_s3, %s564_s3 }
  0xae   :  { %v229_v11 = vrot.slane %v125_v56, %v178_v50 }
  0xaf   :  { %v102_v22 = vpop.xlane.xlu1 %101  ;;  %v179_v62 = vrot.slane %v117_v60, %v178_v50 }
  0xb0   :  { %v78_v28 = vpop.xlane.xlu0 %77  ;;  %v126_v61 = vmul.f32 0.00390625, %v102_v22  ;;  %v230_v55 = vsel %vm180_vm2, %v229_v11, %v225_v51 }
  0xb1   :  { %v118_v34 = vmul.f32 0.00390625, %v78_v28  ;;  %v181_v59 = vsel %vm180_vm2, %v179_v62, %v174_v49 }
  0xb2   :  { %v234_v16 = vrot.slane %v126_v61, %v185_v53 }
  0xb3   :  { %v105_v41 = vpop.xlane.xlu1 %104  ;;  %v186_v63 = vrot.slane %v118_v34, %v185_v53 }
  0xb4   :  { %v81_v48 = vpop.xlane.xlu0 %80  ;;  %v127_v43 = vmul.f32 0.00390625, %v105_v41  ;;  %v235_v47 = vsel %vm187_vm3, %v234_v16, %v230_v55  ;;  %v577_v16 = vld [vmem:[%s943_s4] ss:$0 sm:$0xff]  ;;  %v461_v55 = vsub.s32 1, %v859_v23  ;;  %s661_s4 = scalar_lea.vmem %s564_s3, 4096 }
  0xb5   :  { %v119_v42 = vmul.f32 0.00390625, %v81_v48  ;;  %v188_v37 = vsel %vm187_vm3, %v186_v63, %v181_v59  ;;  %p662_p8 = scmp.ne.s32.totalorder %s564_s3, %s661_s4  ;;  %p667_p10 = scmp.lt.s32.totalorder %s661_s4, %s661_s4 }
  0xb6   :  { %v239_v28 = vrot.slane %v127_v43, %v192_v54 }
  0xb7   :  { %v108_v58 = vpop.xlane.xlu1 %107  ;;  %v193_v52 = vrot.slane %v119_v42, %v192_v54  ;;  %p668_p11 = por %p667_p10, %p666_p9 }
  0xb8   :  { %v84_v10 = vpop.xlane.xlu0 %83  ;;  %v128_v31 = vmul.f32 0.00390625, %v108_v58 }
  0xb9   :  { %v120_v30 = vmul.f32 0.00390625, %v84_v10  ;;  %v195_v19 = vsel %vm194_vm4, %v193_v52, %v188_v37  ;;  %p669_p12 = pnand %p668_p11, %p662_p8 }
  0xba   :  { %v244_v48 = vrot.slane %v128_v31, %v199_v57  ;;  %v240_v31 = vsel %vm194_vm4, %v239_v28, %v235_v47 }
  0xbb   :  { %v111_v46 = vpop.xlane.xlu1 %110  ;;  %v200_v56 = vrot.slane %v120_v30, %v199_v57 }
  0xbc   :  { %v129_v22 = vmul.f32 0.00390625, %v111_v46  ;;  %v87_v36 = vpop.xlane.xlu0 %86  ;;  %v245_v54 = vsel %vm201_vm5, %v244_v48, %v240_v31  ;;  %v426_v48 = vsub.s32 0, %v859_v23 }
  0xbd   :  { %v121_v41 = vmul.f32 0.00390625, %v87_v36  ;;  %v202_v57 = vsel %vm201_vm5, %v200_v56, %v195_v19 }
  0xbe   :  { %v249_v58 = vrot.slane %v129_v22, %v206_v3 }
  0xbf   :  { %v114_v50 = vpop.xlane.xlu1 %113  ;;  %v207_v53 = vrot.slane %v121_v41, %v206_v3 }
  0xc0   :  { %v130_v43 = vmul.f32 0.00390625, %v114_v50  ;;  %v90_v36 = vpop.xlane.xlu0 %89  ;;  %v250_v60 = vsel %vm208_vm6, %v249_v58, %v245_v54 }
  0xc1   :  { %v122_v42 = vmul.f32 0.00390625, %v90_v36  ;;  %v209_v10 = vsel %vm208_vm6, %v207_v53, %v202_v57 }
  0xc2   :  { %v254_v30 = vrot.slane %v130_v43, %v213_v17 }
  0xc3   :  { %v214_v61 = vrot.slane %v122_v42, %v213_v17 }
  0xc4   :  { %v255_v29 = vsel %vm215_vm7, %v254_v30, %v250_v60 }
  0xc5   :  { %v216_v34 = vsel %vm215_vm7, %v214_v61, %v209_v10 }
  0xc6   :  { %v257_v3 = vsel %vm256_vm8, %v255_v29, %v216_v34  ;;  %v959_v34 = vld [vmem:[#allocation8_spill] sm:$0xff] }
  0xc7   :  { %609 = vmatmul.mubr.msk.f32.vlgmr.msra.gmra.mrb[0].mxu0 %vm258_vm9, %v257_v3 }
 0x19a   :  { %v327_v7 = vpop.f32.mrb[0].mxu0 }
 0x19b   :  { %v328_v11 = vadd.f32 %v575_v40, %v327_v7  ;;  %v610_v46 = vpop.f32.mrb[1].mxu0  ;;  %v961_v7 = vld [vmem:[#allocation12_spill] sm:$0xff] }
 0x19d   :  { %v331_v62 = vmax.f32 %v328_v11, 0.0  ;;  %v963_v11 = vld [vmem:[#allocation10_spill] sm:$0xff] }
 0x19f   :  { %614 = vmatmul.mubr.msk.f32.vlgmr.msra.gmra.mrb[0].mxu1 %vm340_vm11, %v331_v62  ;;  %v964_v62 = vld [vmem:[#allocation13_spill] sm:$0xff] }
 0x272   :  { %v414_v22 = vpop.f32.mrb[0].mxu1 }
 0x273   :  { %v415_v63 = vadd.f32 %v577_v16, %v414_v22  ;;  %v615_v28 = vpop.f32.mrb[1].mxu1  ;;  %v965_v22 = vld [vmem:[#allocation14_spill] sm:$0xff] }
 0x275   :  { %v580_v41 = vmul.f32 -1.442695, %v415_v63 }
 0x277   :  { %635 = vpow2.f32 %v580_v41 }
 0x281   :  { %v636_v51 = vpop.eup %635 }
 0x282   :  { %v421_v52 = vadd.f32 1.0, %v636_v51 }
 0x284   :  { %637 = vrcp.f32 %v421_v52 }
 0x28e   :  { %v638_v17 = vpop.eup %637 }
 0x28f   :  { %v427_v49 = vrot.slane %v638_v17, %v426_v48  ;;  %v462_v56 = vrot.slane %v638_v17, %v461_v55 }
 0x291   :  { %433 = vbcast.lane.b32.xlu1 %v427_v49, 264  ;;  %429 = vbcast.lane.b32.xlu0 %v427_v49, 256 }
 0x295   :  { %437 = vbcast.lane.b32.xlu1 %v427_v49, 272  ;;  %445 = vbcast.lane.b32.xlu0 %v427_v49, 288 }
 0x299   :  { %441 = vbcast.lane.b32.xlu1 %v427_v49, 280  ;;  %453 = vbcast.lane.b32.xlu0 %v427_v49, 304 }
 0x29d   :  { %449 = vbcast.lane.b32.xlu1 %v427_v49, 296  ;;  %464 = vbcast.lane.b32.xlu0 %v462_v56, 256 }
 0x2a1   :  { %457 = vbcast.lane.b32.xlu1 %v427_v49, 312  ;;  %472 = vbcast.lane.b32.xlu0 %v462_v56, 272 }
 0x2a5   :  { %468 = vbcast.lane.b32.xlu1 %v462_v56, 264  ;;  %480 = vbcast.lane.b32.xlu0 %v462_v56, 288 }
 0x2a9   :  { %476 = vbcast.lane.b32.xlu1 %v462_v56, 280  ;;  %488 = vbcast.lane.b32.xlu0 %v462_v56, 304 }
 0x2ad   :  { %484 = vbcast.lane.b32.xlu1 %v462_v56, 296 }
 0x2b1   :  { %492 = vbcast.lane.b32.xlu1 %v462_v56, 312 }
 0x303   :  { %v434_v58 = vpop.permute.xlu1 %433  ;;  %v430_v50 = vpop.permute.xlu0 %429 }
 0x304   :  { %v496_v59 = vmul.f32 %v434_v58, %v755_v8  ;;  %v497_v47 = vmul.f32 %v434_v58, %v757_v9  ;;  %v494_v23 = vmul.f32 %v430_v50, %v743_v2  ;;  %v495_v53 = vmul.f32 %v430_v50, %v747_v4 }
 0x306   :  { %528 = vst [vmem:[#allocation5 + $0x10] sm:$0xff] %v496_v59  ;;  %529 = vst [vmem:[#allocation5 + $0x18] sm:$0xff] %v497_v47 }
 0x307   :  { %526 = vst [vmem:[#allocation5] sm:$0xff] %v494_v23  ;;  %527 = vst [vmem:[#allocation5 + $0x8] sm:$0xff] %v495_v53  ;;  %v438_v43 = vpop.permute.xlu1 %437  ;;  %v446_v36 = vpop.permute.xlu0 %445 }
 0x308   :  { %v498_v37 = vmul.f32 %v438_v43, %v767_v14  ;;  %v499_v31 = vmul.f32 %v438_v43, %v769_v15  ;;  %v502_v42 = vmul.f32 %v446_v36, %v791_v26  ;;  %v503_v8 = vmul.f32 %v446_v36, %v793_v27 }
 0x30a   :  { %530 = vst [vmem:[#allocation5 + $0x20] sm:$0xff] %v498_v37  ;;  %531 = vst [vmem:[#allocation5 + $0x28] sm:$0xff] %v499_v31 }
 0x30b   :  { %534 = vst [vmem:[#allocation5 + $0x40] sm:$0xff] %v502_v42  ;;  %535 = vst [vmem:[#allocation5 + $0x48] sm:$0xff] %v503_v8  ;;  %v442_v2 = vpop.permute.xlu1 %441  ;;  %v454_v4 = vpop.permute.xlu0 %453 }
 0x30c   :  { %v500_v9 = vmul.f32 %v442_v2, %v779_v20  ;;  %v501_v19 = vmul.f32 %v442_v2, %v781_v21  ;;  %v506_v54 = vmul.f32 %v454_v4, %v815_v38  ;;  %v507_v14 = vmul.f32 %v454_v4, %v817_v39 }
 0x30e   :  { %532 = vst [vmem:[#allocation5 + $0x30] sm:$0xff] %v500_v9  ;;  %533 = vst [vmem:[#allocation5 + $0x38] sm:$0xff] %v501_v19 }
 0x30f   :  { %538 = vst [vmem:[#allocation5 + $0x60] sm:$0xff] %v506_v54  ;;  %539 = vst [vmem:[#allocation5 + $0x68] sm:$0xff] %v507_v14  ;;  %v450_v15 = vpop.permute.xlu1 %449  ;;  %v465_v26 = vpop.permute.xlu0 %464 }
 0x310   :  { %v504_v27 = vmul.f32 %v450_v15, %v803_v32  ;;  %v505_v30 = vmul.f32 %v450_v15, %v805_v33  ;;  %v510_v57 = vmul.f32 %v465_v26, %v739_v0  ;;  %v511_v20 = vmul.f32 %v465_v26, %v741_v1 }
 0x312   :  { %536 = vst [vmem:[#allocation5 + $0x50] sm:$0xff] %v504_v27  ;;  %537 = vst [vmem:[#allocation5 + $0x58] sm:$0xff] %v505_v30 }
 0x313   :  { %542 = vst [vmem:[#allocation5 + $0x80] sm:$0xff] %v510_v57  ;;  %543 = vst [vmem:[#allocation5 + $0x88] sm:$0xff] %v511_v20  ;;  %v458_v21 = vpop.permute.xlu1 %457  ;;  %v473_v38 = vpop.permute.xlu0 %472 }
 0x314   :  { %v508_v39 = vmul.f32 %v458_v21, %v827_v44  ;;  %v509_v60 = vmul.f32 %v458_v21, %v829_v45  ;;  %v514_v61 = vmul.f32 %v473_v38, %v763_v12  ;;  %v515_v32 = vmul.f32 %v473_v38, %v765_v13 }
 0x316   :  { %540 = vst [vmem:[#allocation5 + $0x70] sm:$0xff] %v508_v39  ;;  %541 = vst [vmem:[#allocation5 + $0x78] sm:$0xff] %v509_v60 }
 0x317   :  { %546 = vst [vmem:[#allocation5 + $0xa0] sm:$0xff] %v514_v61  ;;  %547 = vst [vmem:[#allocation5 + $0xa8] sm:$0xff] %v515_v32  ;;  %v469_v0 = vpop.permute.xlu1 %468  ;;  %v481_v1 = vpop.permute.xlu0 %480 }
 0x318   :  { %v512_v33 = vmul.f32 %v469_v0, %v749_v5  ;;  %v513_v10 = vmul.f32 %v469_v0, %v751_v6  ;;  %v518_v29 = vmul.f32 %v481_v1, %v787_v24  ;;  %v519_v44 = vmul.f32 %v481_v1, %v789_v25  ;;  %v962_v24 = vld [vmem:[#allocation9_spill] sm:$0xff] }
 0x31a   :  { %544 = vst [vmem:[#allocation5 + $0x90] sm:$0xff] %v512_v33  ;;  %545 = vst [vmem:[#allocation5 + $0x98] sm:$0xff] %v513_v10 }
 0x31b   :  { %550 = vst [vmem:[#allocation5 + $0xc0] sm:$0xff] %v518_v29  ;;  %551 = vst [vmem:[#allocation5 + $0xc8] sm:$0xff] %v519_v44  ;;  %v477_v12 = vpop.permute.xlu1 %476  ;;  %v489_v13 = vpop.permute.xlu0 %488 }
 0x31c   :  { %v516_v45 = vmul.f32 %v477_v12, %v775_v18  ;;  %v517_v3 = vmul.f32 %v477_v12, %v959_v34  ;;  %v522_v40 = vmul.f32 %v489_v13, %v960_v35  ;;  %v523_v5 = vmul.f32 %v489_v13, %v961_v7 }
 0x31e   :  { %548 = vst [vmem:[#allocation5 + $0xb0] sm:$0xff] %v516_v45  ;;  %549 = vst [vmem:[#allocation5 + $0xb8] sm:$0xff] %v517_v3 }
 0x31f   :  { %554 = vst [vmem:[#allocation5 + $0xe0] sm:$0xff] %v522_v40  ;;  %555 = vst [vmem:[#allocation5 + $0xe8] sm:$0xff] %v523_v5  ;;  %v485_v6 = vpop.permute.xlu1 %484 }
 0x320   :  { %v520_v25 = vmul.f32 %v485_v6, %v962_v24  ;;  %v521_v46 = vmul.f32 %v485_v6, %v963_v11 }
 0x322   :  { %552 = vst [vmem:[#allocation5 + $0xd0] sm:$0xff] %v520_v25  ;;  %553 = vst [vmem:[#allocation5 + $0xd8] sm:$0xff] %v521_v46 }
 0x323   :  { %v493_v18 = vpop.permute.xlu1 %492 }
 0x324   :  { %v524_v16 = vmul.f32 %v493_v18, %v964_v62  ;;  %v525_v63 = vmul.f32 %v493_v18, %v965_v22 }
 0x326   :  { %556 = vst [vmem:[#allocation5 + $0xf0] sm:$0xff] %v524_v16  ;;  %557 = vst [vmem:[#allocation5 + $0xf8] sm:$0xff] %v525_v63 }
 0x327   :  { %672 = shalt.err (!%p669_p12)
}
 0x328   :  { %s673_s6 = scalar_lea.hbm %s944_s5, 4096 }
 0x329   :  { %p674_p13 = scmp.ne.s32.totalorder %s944_s5, %s673_s6  ;;  %p677_p0 = scmp.lt.u32.totalorder %s673_s6, %s944_s5 }
 0x32b   :  { %p679_p1 = pnand %p677_p0, %p674_p13 }
 0x32d   :  { %682 = shalt.err (!%p679_p1)
}
 0x32e   :  { %569 = dma.vmem_to_hbm [thread:$0]  %s564_s3, 4096, %s944_s5, [#allocation4], %s688_s28, %s688_s28, %s689_s29  }
 0x32f   :  { %685 = dma.done.wait [#allocation4], 4096  }
 0x330   :  { %686 = vsyncadd [#allocation4], 4294963200 }
 0x331   :  { %573 = vsyncpa [#allocation3], 1 }
 0x332   :  { %574 = vsyncpa [#allocation4], 1 }

</bundles_post_ra>
